<compile_context>
chip_gen: v6e
topology: v6e:2x2x1
jax: 0.10.0
libtpu: 0.0.40
codegen_flags: <defaults>
</compile_context>

<pallas_src>
import functools

import jax
import jax.numpy as jnp
from jax.experimental import pallas as pl
from jax.experimental.pallas import tpu as pltpu

_MiB = 1024 * 1024
_LANES = 128


def _vmem_capacity_bytes():
    try:
        cap = getattr(pltpu.get_tpu_info(), "vmem_capacity_bytes", None)
        if cap:
            return int(cap)
    except Exception:
        pass
    return 64 * _MiB          # conservative default (v7x per-core VMEM)


def _round_down(x, m):
    return (x // m) * m


# --------------------------------------------------------------------------
# Path 1: small feature maps — fully fused, batch-packed single-block kernel.
# --------------------------------------------------------------------------
def _fused_small_kernel(x_ref, w1_ref, w2_ref, o_ref, *, hw_total):
    # x_ref: (Bt, C, HW)   w1_ref: (hidden, C)   w2_ref: (C, hidden)
    # o_ref: (Bt, C)
    bt = x_ref.shape[0]
    x = x_ref[...].astype(jnp.float32)
    avg = jnp.sum(x, axis=-1) * (1.0 / float(hw_total))          # (Bt, C)
    mx = jnp.max(x, axis=-1)                                     # (Bt, C)
    pooled = jnp.concatenate([avg, mx], axis=0)                  # (2*Bt, C)
    # h = pooled @ w1.T (contract channel dim; transposed matmul handled by
    # dot_general dimension numbers, no explicit relayouts).
    h = jax.lax.dot_general(pooled, w1_ref[...],
                            dimension_numbers=(((1,), (1,)), ((), ())),
                            preferred_element_type=jnp.float32)  # (2*Bt, hidden)
    h = jnp.maximum(h, 0.0)
    z = jax.lax.dot_general(h, w2_ref[...],
                            dimension_numbers=(((1,), (1,)), ((), ())),
                            preferred_element_type=jnp.float32)  # (2*Bt, C)
    att = jax.nn.sigmoid(z[:bt] + z[bt:])                        # (Bt, C)
    o_ref[...] = att.astype(o_ref.dtype)


# --------------------------------------------------------------------------
# Path 2: large feature maps — chunked (and optionally core-split) pooling.
# --------------------------------------------------------------------------
def _pool_chunk_kernel(x_ref, o_ref, sum_ref, max_ref, *,
                       hw_total, chunk, nk_per_s, has_partial):
    # x_ref: (C, chunk) tile     o_ref: (C, 2) partial (sum, max) for this slice
    # sum_ref / max_ref: (C, 128) f32 lane-wide running accumulators
    s_idx = pl.program_id(1)
    k = pl.program_id(2)
    lw = sum_ref.shape[-1]

    @pl.when(k == 0)
    def _init():
        sum_ref[...] = jnp.zeros_like(sum_ref)
        max_ref[...] = jnp.full_like(max_ref, -jnp.inf)

    def _accumulate(xs, xm):
        # Fold the chunk down to lane width with pure elementwise VALU ops;
        # the single cross-lane (XLU) reduction happens only in the finalize.
        s = xs[:, 0:lw]
        m = xm[:, 0:lw]
        for j in range(1, chunk // lw):
            s = s + xs[:, j * lw:(j + 1) * lw]
            m = jnp.maximum(m, xm[:, j * lw:(j + 1) * lw])
        sum_ref[...] += s
        max_ref[...] = jnp.maximum(max_ref[...], m)

    if has_partial:
        start = (s_idx * nk_per_s + k) * chunk

        @pl.when(start + chunk <= hw_total)          # steady state: mask-free
        def _full():
            xv = x_ref[...].astype(jnp.float32)
            _accumulate(xv, xv)

        @pl.when(jnp.logical_and(start < hw_total, start + chunk > hw_total))
        def _tail():                                  # runs at most once
            xv = x_ref[...].astype(jnp.float32)
            lane = jax.lax.broadcasted_iota(jnp.int32, xv.shape, 1)
            keep = lane < (hw_total - start)
            _accumulate(jnp.where(keep, xv, 0.0),
                        jnp.where(keep, xv, -jnp.inf))
        # Chunks entirely past hw_total (possible only when the core split S
        # does not divide the chunk count) contribute nothing.
    else:
        xv = x_ref[...].astype(jnp.float32)
        _accumulate(xv, xv)

    @pl.when(k == nk_per_s - 1)
    def _finalize():
        o_ref[...] = jnp.concatenate(
            [jnp.sum(sum_ref[...], axis=-1, keepdims=True),
             jnp.max(max_ref[...], axis=-1, keepdims=True)], axis=1)  # (C, 2)


# --------------------------------------------------------------------------
# Wrapper.
# --------------------------------------------------------------------------
def channel_attention(x, w1, w2):
    """x: (B, C, H, W).  w1: (hidden, C) = Conv2d(C, hidden, 1) weight (squeezed).
    w2: (C, hidden) = Conv2d(hidden, C, 1) weight (squeezed).
    Returns sigmoid(mlp(avgpool(x)) + mlp(maxpool(x))) with shape (B, C, 1, 1)."""
    B, C, H, W = x.shape
    hidden = w1.shape[0]
    HW = H * W
    x_flat = x.reshape(B, C, HW)                    # zero-copy NCHW view
    itemsize = jnp.dtype(x.dtype).itemsize
    out_dtype = x.dtype

    vmem_cap = _vmem_capacity_bytes()
    # Generation-aware per-block budget: ~6 MiB on 128-MiB-VMEM parts
    # (v5e/v6e), ~3 MiB on 64-MiB parts (v7x).
    target_block_bytes = max(2 * _MiB, min(8 * _MiB, vmem_cap // 20))
    slab_bytes = C * HW * itemsize                  # one image's (C, HW) slab

    if slab_bytes <= target_block_bytes or HW < 2 * _LANES:
        # ------------- fused single-block path (small feature maps) --------
        # TODO(synk): the pathological large-C / tiny-HW case (slab >> VMEM
        # budget but HW too small to chunk) should tile channels instead; not
        # needed for realistic CBAM shapes.
        bt = max(1, min(B, 8, target_block_bytes // max(slab_bytes, 1)))
        block_bytes = bt * slab_bytes
        vmem_limit = int(min(vmem_cap * 3 // 4,
                             max(32 * _MiB, 3 * block_bytes + 4 * _MiB)))
        cost = pl.CostEstimate(
            flops=2 * B * C * HW + 8 * B * C * hidden + 2 * B * C,
            transcendentals=B * C,
            bytes_accessed=(x_flat.size * itemsize
                            + w1.size * jnp.dtype(w1.dtype).itemsize
                            + w2.size * jnp.dtype(w2.dtype).itemsize
                            + B * C * itemsize))
        out = pl.pallas_call(
            functools.partial(_fused_small_kernel, hw_total=HW),
            out_shape=jax.ShapeDtypeStruct((B, C), out_dtype),
            grid_spec=pltpu.PrefetchScalarGridSpec(
                num_scalar_prefetch=0,
                grid=(pl.cdiv(B, bt),),
                in_specs=[
                    pl.BlockSpec((bt, C, HW), lambda b: (b, 0, 0)),
                    pl.BlockSpec((hidden, C), lambda b: (0, 0)),
                    pl.BlockSpec((C, hidden), lambda b: (0, 0)),
                ],
                out_specs=pl.BlockSpec((bt, C), lambda b: (b, 0)),
            ),
            compiler_params=pltpu.CompilerParams(
                dimension_semantics=("parallel",),
                vmem_limit_bytes=vmem_limit),
            cost_estimate=cost,
        )(x_flat, w1, w2)
        return out.reshape(B, C, 1, 1)

    # ---------------- chunked spatial-reduction path (large feature maps) ---
    # Chunk width: multiple of 128 lanes, >= 4 KiB contiguous per channel row
    # (DMA burst efficiency), sized to the per-block budget, hard-capped so the
    # double-buffered footprint stays well inside VMEM.
    min_lanes = max(4 * _LANES,
                    ((4096 // itemsize + _LANES - 1) // _LANES) * _LANES)
    fit_lanes = _round_down(target_block_bytes // (C * itemsize), _LANES)
    cap_lanes = _round_down(max(vmem_cap // 6, target_block_bytes)
                            // (C * itemsize), _LANES)
    chunk = max(fit_lanes, min_lanes)
    chunk = min(chunk, max(cap_lanes, _LANES))      # VMEM wins over contiguity
    chunk = min(chunk, _round_down(HW, _LANES))
    chunk = max(chunk, _LANES)

    nk_total = pl.cdiv(HW, chunk)
    # Use both TensorCores when there is only one image: split the spatial
    # reduction into S parallel slices, combine the partials in the epilogue.
    S = 2 if (B == 1 and nk_total >= 2) else 1
    nk_per_s = pl.cdiv(nk_total, S)
    has_partial = (HW % chunk != 0) or (S * nk_per_s != nk_total)

    block_bytes = C * chunk * itemsize
    vmem_limit = int(min(vmem_cap * 3 // 4,
                         max(32 * _MiB, 3 * block_bytes + 4 * _MiB)))

    kernel = functools.partial(_pool_chunk_kernel, hw_total=HW, chunk=chunk,
                               nk_per_s=nk_per_s, has_partial=has_partial)
    cost = pl.CostEstimate(
        flops=2 * B * C * HW, transcendentals=0,
        bytes_accessed=x_flat.size * itemsize + B * S * C * 2 * 4)

    def x_index(b, s, k):
        g = s * nk_per_s + k
        return (b, 0, jnp.minimum(g, nk_total - 1))

    pooled = pl.pallas_call(
        kernel,
        out_shape=jax.ShapeDtypeStruct((B, S, C, 2), jnp.float32),
        grid_spec=pltpu.PrefetchScalarGridSpec(
            num_scalar_prefetch=0,
            grid=(B, S, nk_per_s),                   # reduction axis last
            in_specs=[pl.BlockSpec((None, C, chunk), x_index)],
            out_specs=pl.BlockSpec((None, None, C, 2),
                                   lambda b, s, k: (b, s, 0, 0)),
            scratch_shapes=[
                pltpu.VMEM((C, _LANES), jnp.float32),   # lane-wide running sum
                pltpu.VMEM((C, _LANES), jnp.float32),   # lane-wide running max
            ],
        ),
        compiler_params=pltpu.CompilerParams(
            dimension_semantics=("parallel", "parallel", "arbitrary"),
            vmem_limit_bytes=vmem_limit),
        cost_estimate=cost,
    )(x_flat)

    # Tiny epilogue: combine the S slice partials and run the shared MLP.  The
    # MLP is O(C*hidden) FLOPs — negligible vs. streaming x — and doing it here
    # is what allows the spatial reduction to be split across both TensorCores.
    avg = jnp.sum(pooled[..., 0], axis=1) * (1.0 / float(HW))   # (B, C)
    mx = jnp.max(pooled[..., 1], axis=1)                        # (B, C)

    def mlp(v):
        h = jnp.maximum(v @ w1.astype(jnp.float32).T, 0.0)
        return h @ w2.astype(jnp.float32).T

    att = jax.nn.sigmoid(mlp(avg) + mlp(mx)).astype(out_dtype)
    return att.reshape(B, C, 1, 1)


# --------------------------------------------------------------------------
# Correctness harness.
# --------------------------------------------------------------------------
def _reference(x, w1, w2):
    avg = jnp.mean(x, axis=(2, 3))                 # (B, C)
    mx = jnp.max(x, axis=(2, 3))                   # (B, C)

    def mlp(v):                                    # v: (B, C)
        return jnp.maximum(v @ w1.T, 0.0) @ w2.T

    return jax.nn.sigmoid(mlp(avg) + mlp(mx))[:, :, None, None]


def _run_case(key, B, C, H, W, ratio):
    hidden = max(C // ratio, 1)
    kx, k1, k2 = jax.random.split(key, 3)
    x = jax.random.normal(kx, (B, C, H, W), dtype=jnp.float32)
    w1 = jax.random.normal(k1, (hidden, C), dtype=jnp.float32) * 0.1
    w2 = jax.random.normal(k2, (C, hidden), dtype=jnp.float32) * 0.1

    y = jax.block_until_ready(channel_attention(x, w1, w2))
    y_ref = _reference(x, w1, w2)
    assert y.shape == (B, C, 1, 1)
    assert jnp.allclose(y, y_ref, atol=1e-5, rtol=1e-5), \
        f"mismatch vs reference for shape {(B, C, H, W)}"


if __name__ == "__main__":
    key = jax.random.PRNGKey(0)
    k_a, k_b, k_c = jax.random.split(key, 3)

    # Small feature map: fused single-block path, batch-packed (Bt = 2).
    _run_case(k_a, B=2, C=32, H=16, W=16, ratio=16)
    # Small feature map where B is not a multiple of the batch-pack factor
    # (exercises the padded final block on the batch axis).
    _run_case(k_b, B=10, C=8, H=8, W=8, ratio=4)
    # Large feature map with B == 1: chunked reduction with mask-free steady
    # state, masked tail chunk, and the S = 2 dual-TensorCore spatial split.
    _run_case(k_c, B=1, C=128, H=130, W=130, ratio=16)

    print("KERNEL_OK")
</pallas_src>

<mosaic_0001>
module attributes {stable_mosaic.version = 11 : i64} {
  func.func @_fused_small_kernel(%arg0: i32, %arg1: memref<2x32x256xf32, #tpu.memory_space<vmem>>, %arg2: memref<2x32xf32, #tpu.memory_space<vmem>>, %arg3: memref<32x2xf32, #tpu.memory_space<vmem>>, %arg4: memref<2x32xf32, #tpu.memory_space<vmem>>) attributes {dimension_semantics = [#tpu.dimension_semantics<parallel>], iteration_bounds = array<i64: 1>, scalar_prefetch = 0 : i64, scratch_operands = 0 : i64, tpu.core_type = #tpu.core_type<tc>, window_params = [{transform_indices = @transform_0, window_bounds = array<i64: 2, 32, 256>}, {pipeline_mode = #tpu.pipeline_mode<synchronous>, transform_indices = @transform_1, window_bounds = array<i64: 2, 32>}, {pipeline_mode = #tpu.pipeline_mode<synchronous>, transform_indices = @transform_2, window_bounds = array<i64: 32, 2>}, {transform_indices = @transform_3, window_bounds = array<i64: 2, 32>}]} {
    %c0 = arith.constant 0 : index
    %c0_0 = arith.constant 0 : index
    %c0_1 = arith.constant 0 : index
    %0 = vector.load %arg1[%c0, %c0_0, %c0_1] : memref<2x32x256xf32, #tpu.memory_space<vmem>>, vector<2x32x256xf32>
    %cst = arith.constant dense<0.000000e+00> : vector<2x32xf32>
    %1 = vector.multi_reduction <add>, %0, %cst [2] : vector<2x32x256xf32> to vector<2x32xf32>
    %cst_2 = arith.constant 3.906250e-03 : f32
    %2 = vector.broadcast %cst_2 : f32 to vector<2x32xf32>
    %3 = arith.mulf %1, %2 : vector<2x32xf32>
    %cst_3 = arith.constant dense<0xFF800000> : vector<2x32xf32>
    %4 = vector.multi_reduction <maximumf>, %0, %cst_3 [2] : vector<2x32x256xf32> to vector<2x32xf32>
    %5 = tpu.concatenate %3, %4 in 0 : vector<2x32xf32>, vector<2x32xf32> -> vector<4x32xf32>
    %c0_4 = arith.constant 0 : index
    %c0_5 = arith.constant 0 : index
    %6 = vector.load %arg2[%c0_4, %c0_5] : memref<2x32xf32, #tpu.memory_space<vmem>>, vector<2x32xf32>
    %cst_6 = arith.constant dense<0.000000e+00> : vector<4x2xf32>
    %7 = tpu.matmul %5, %6, %cst_6 {dimension_numbers = #tpu.dot_dimension_numbers<[1], [1], [0], [0], [0, 0, 1, 0], [], []>} : vector<4x32xf32>, vector<2x32xf32>, vector<4x2xf32> -> vector<4x2xf32>
    %cst_7 = arith.constant 0.000000e+00 : f32
    %8 = vector.broadcast %cst_7 : f32 to vector<4x2xf32>
    %9 = arith.maximumf %7, %8 : vector<4x2xf32>
    %c0_8 = arith.constant 0 : index
    %c0_9 = arith.constant 0 : index
    %10 = vector.load %arg3[%c0_8, %c0_9] : memref<32x2xf32, #tpu.memory_space<vmem>>, vector<32x2xf32>
    %cst_10 = arith.constant dense<0.000000e+00> : vector<4x32xf32>
    %11 = tpu.matmul %9, %10, %cst_10 {dimension_numbers = #tpu.dot_dimension_numbers<[1], [1], [0], [0], [0, 0, 1, 0], [], []>} : vector<4x2xf32>, vector<32x2xf32>, vector<4x32xf32> -> vector<4x32xf32>
    %12 = vector.extract_strided_slice %11 {offsets = [0, 0], sizes = [2, 32], strides = [1, 1]} : vector<4x32xf32> to vector<2x32xf32>
    %13 = vector.extract_strided_slice %11 {offsets = [2, 0], sizes = [2, 32], strides = [1, 1]} : vector<4x32xf32> to vector<2x32xf32>
    %14 = arith.addf %12, %13 : vector<2x32xf32>
    %15 = arith.negf %14 : vector<2x32xf32>
    %16 = math.exp %15 : vector<2x32xf32>
    %cst_11 = arith.constant 1.000000e+00 : f32
    %17 = vector.broadcast %cst_11 : f32 to vector<2x32xf32>
    %18 = arith.addf %17, %16 : vector<2x32xf32>
    %19 = arith.divf %17, %18 : vector<2x32xf32>
    %c0_12 = arith.constant 0 : index
    %c0_13 = arith.constant 0 : index
    %20 = vector.load %arg4[%c0_12, %c0_13] : memref<2x32xf32, #tpu.memory_space<vmem>>, vector<2x32xf32>
    tpu.vector_store %arg4[%c0_12, %c0_13], %19 {strides = array<i32>} : memref<2x32xf32, #tpu.memory_space<vmem>>, vector<2x32xf32>,
    return
  }
  func.func @transform_0(%arg0: i32) -> (i32, i32, i32) {
    %c0_i32 = arith.constant 0 : i32
    %c0_i32_0 = arith.constant 0 : i32
    %c0_i32_1 = arith.constant 0 : i32
    return %arg0, %c0_i32, %c0_i32_0 : i32, i32, i32
  }
  func.func @transform_1(%arg0: i32) -> (i32, i32) {
    %c0_i32 = arith.constant 0 : i32
    %c0_i32_0 = arith.constant 0 : i32
    %c0_i32_1 = arith.constant 0 : i32
    return %c0_i32, %c0_i32_0 : i32, i32
  }
  func.func @transform_2(%arg0: i32) -> (i32, i32) {
    %c0_i32 = arith.constant 0 : i32
    %c0_i32_0 = arith.constant 0 : i32
    %c0_i32_1 = arith.constant 0 : i32
    return %c0_i32, %c0_i32_0 : i32, i32
  }
  func.func @transform_3(%arg0: i32) -> (i32, i32) {
    %c0_i32 = arith.constant 0 : i32
    %c0_i32_0 = arith.constant 0 : i32
    return %arg0, %c0_i32 : i32, i32
  }
}

</mosaic_0001>

<bundles_post_ra>
// kernel: tpu_custom_call.1
= control target key start
LH: loop header
LB: loop body
LE: loop exit
PB: predicated region body
PF: predicated region fallthrough
CT: control target
= control target key end

     0   :  { %8 = vsyncpa [#allocation3], 0  ;;  %s556_s0 = inlined_call_operand.hbm [shape: f32[2,32,256], index: 0, kind: input, shape index: {}]   ;;  %s557_s1 = inlined_call_operand.vmem [shape: f32[2,32], index: 1, kind: input, shape index: {}]   ;;  %s558_s2 = inlined_call_operand.vmem [shape: f32[32,2], index: 2, kind: input, shape index: {}]   ;;  %s559_s3 = inlined_call_operand.hbm [shape: f32[2,32], index: 3, kind: output, shape index: {}]  }
   0x1   :  { %9 = vsyncpa [#allocation4], 0  ;;  %s490_s12 = smov [#allocation2]  }
   0x2   :  { %s15_s13 = sshll.u32 %s490_s12, 4  ;;  %s16_s13 = int_to_ptr.vmem [resolvable:$true] %s15_s13 }
   0x3   :  { %s454_s14 = scalar_lea.vmem %s16_s13, 2048  ;;  %p459_p1 = scmp.lt.s32.totalorder %s16_s13, %s16_s13 }
   0x4   :  { %p455_p0 = scmp.ne.s32.totalorder %s16_s13, %s454_s14  ;;  %p460_p2 = scmp.lt.s32.totalorder %s454_s14, %s454_s14 }
   0x6   :  { %p461_p3 = por %p460_p2, %p459_p1 }
   0x8   :  { %p462_p4 = pnand %p461_p3, %p455_p0 }
   0xa   :  { %465 = shalt.err (!%p462_p4)
}
   0xb   :  { %s491_s15 = smov 256   ;;  %s492_s16 = smov 16  }
   0xc   :  { %21 = dma.hbm_to_vmem [thread:$0]  %s556_s0, 2048, %s16_s13, [#allocation3], %s491_s15, %s491_s15, %s492_s16  }
   0xd   :  { %486 = dma.done.wait [#allocation3], 2048  }
   0xe   :  { %487 = vsyncadd [#allocation3], 4294965248  ;;  %v37_v0 = vld [vmem:[#allocation2 + $0x40] sm:$0xff]  ;;  %v38_v1 = vld [vmem:[#allocation2 + $0x48] sm:$0xff]  ;;  %v493_v32 = vmov 0.0   ;;  %vm210_vm0 = vcmask 261120   ;;  %v109_v42 = vlaneseq }
   0xf   :  { %v29_v2 = vld [vmem:[#allocation2] sm:$0xff]  ;;  %v57_v3 = vadd.f32 %v38_v1, %v37_v0  ;;  %v30_v4 = vld [vmem:[#allocation2 + $0x8] sm:$0xff]  ;;  %v39_v5 = vld [vmem:[#allocation2 + $0x50] sm:$0xff]  ;;  %v89_v27 = vmax.f32 %v37_v0, %v38_v1  ;;  %420 = vmatprep.subr.mxu0 %v493_v32  ;;  %425 = vmatprep.subr.mxu1 %v493_v32  ;;  %vm494_vm1 = vmmov 0   ;;  %vm292_vm2 = vcmask 15360   ;;  %s495_s27 = smov [#allocation5]  }
  0x10   :  { %v40_v6 = vld [vmem:[#allocation2 + $0x58] sm:$0xff]  ;;  %v45_v7 = vadd.f32 %v30_v4, %v29_v2  ;;  %v31_v8 = vld [vmem:[#allocation2 + $0x10] sm:$0xff]  ;;  %v41_v12 = vld [vmem:[#allocation2 + $0x60] sm:$0xff]  ;;  %v77_v25 = vmax.f32 %v29_v2, %v30_v4  ;;  %422 = vmatprep.mubr.msk.f32.mxu0 %vm494_vm1, %v493_v32  ;;  %433 = vmatprep.mubr.msk.f32.mxu1 %vm494_vm1, %v493_v32  ;;  %v110_v45 = vand.u32 127, %v109_v42  ;;  %v112_v47 = vshrl.u32 %v109_v42, 7  ;;  %s396_s28 = sshll.u32 %s495_s27, 4  ;;  %s397_s28 = int_to_ptr.vmem [resolvable:$true] %s396_s28 }
  0x11   :  { %v32_v9 = vld [vmem:[#allocation2 + $0x18] sm:$0xff]  ;;  %58 = vadd.xlane.f32.xlu1 %v57_v3  ;;  %v60_v10 = vadd.f32 %v40_v6, %v39_v5  ;;  %v42_v13 = vld [vmem:[#allocation2 + $0x68] sm:$0xff]  ;;  %v33_v14 = vld [vmem:[#allocation2 + $0x20] sm:$0xff]  ;;  %v92_v26 = vmax.f32 %v39_v5, %v40_v6  ;;  %vm120_vm3 = vcmask 130112   ;;  %vm127_vm4 = vcmask 195712   ;;  %p471_p6 = scmp.lt.s32.totalorder %s397_s28, %s397_s28 }
  0x12   :  { %46 = vadd.xlane.f32.xlu0 %v45_v7  ;;  %v48_v11 = vadd.f32 %v32_v9, %v31_v8  ;;  %v34_v15 = vld [vmem:[#allocation2 + $0x28] sm:$0xff]  ;;  %v63_v16 = vadd.f32 %v42_v13, %v41_v12  ;;  %v43_v18 = vld [vmem:[#allocation2 + $0x70] sm:$0xff]  ;;  %v44_v19 = vld [vmem:[#allocation2 + $0x78] sm:$0xff]  ;;  %v80_v24 = vmax.f32 %v31_v8, %v32_v9  ;;  %v95_v28 = vmax.f32 %v41_v12, %v42_v13 }
  0x13   :  { %v51_v17 = vadd.f32 %v34_v15, %v33_v14  ;;  %v35_v20 = vld [vmem:[#allocation2 + $0x30] sm:$0xff]  ;;  %v36_v21 = vld [vmem:[#allocation2 + $0x38] sm:$0xff]  ;;  %v66_v22 = vadd.f32 %v44_v19, %v43_v18  ;;  %v83_v29 = vmax.f32 %v33_v14, %v34_v15  ;;  %v98_v30 = vmax.f32 %v43_v18, %v44_v19  ;;  %v209_v33 = vld [vmem:[%s557_s1] sm:$0x3] }
  0x14   :  { %v54_v23 = vadd.f32 %v36_v21, %v35_v20  ;;  %v86_v31 = vmax.f32 %v35_v20, %v36_v21  ;;  %421 = vmatpush3.xpose.msk.msra.mxu0 %vm210_vm0, %v209_v33  ;;  %v291_v34 = vld [vmem:[%s558_s2 + $0x18] sm:$0xff]  ;;  %v290_v35 = vld [vmem:[%s558_s2 + $0x10] sm:$0xff]  ;;  %v289_v36 = vld [vmem:[%s558_s2 + $0x8] sm:$0xff]  ;;  %v115_v48 = vadd.s32 4294967288, %v110_v45  ;;  %v122_v49 = vadd.s32 4294967280, %v110_v45 }
  0x15   :  { %61 = vadd.xlane.f32.xlu1 %v60_v10  ;;  %426 = vmatpush3.xpose.msk.msra.mxu1 %vm292_vm2, %v291_v34  ;;  %v129_v51 = vadd.s32 4294967272, %v110_v45  ;;  %v113_v53 = vsub.s32 %v110_v45, %v112_v47  ;;  %vm134_vm5 = vcmask 261312   ;;  %vm155_vm6 = vcmask 1041409  }
  0x16   :  { %49 = vadd.xlane.f32.xlu0 %v48_v11  ;;  %427 = vmatprep.subr.mxu1 %v493_v32  ;;  %v118_v54 = vsub.s32 %v115_v48, %v112_v47  ;;  %v125_v56 = vsub.s32 %v122_v49, %v112_v47  ;;  %vm204_vm7 = vcmask 1043459   ;;  %vm207_vm8 = vcmask 1041408  }
  0x17   :  { %v132_v63 = vsub.s32 %v129_v51, %v112_v47  ;;  %vm388_vm9 = vcmask 254976  }
  0x19   :  { %64 = vadd.xlane.f32.xlu1 %v63_v16  ;;  %428 = vmatpush3.xpose.msk.msra.mxu1 %vm292_vm2, %v290_v35 }
  0x1a   :  { %52 = vadd.xlane.f32.xlu0 %v51_v17  ;;  %429 = vmatprep.subr.mxu1 %v493_v32 }
  0x1d   :  { %67 = vadd.xlane.f32.xlu1 %v66_v22  ;;  %430 = vmatpush3.xpose.msk.msra.mxu1 %vm292_vm2, %v289_v36 }
  0x1e   :  { %55 = vadd.xlane.f32.xlu0 %v54_v23  ;;  %431 = vmatprep.subr.mxu1 %v493_v32 }
  0x21   :  { %81 = vmax.xlane.f32.xlu1 %v80_v24 }
  0x22   :  { %78 = vmax.xlane.f32.xlu0 %v77_v25 }
  0x25   :  { %93 = vmax.xlane.f32.xlu1 %v92_v26 }
  0x26   :  { %90 = vmax.xlane.f32.xlu0 %v89_v27 }
  0x29   :  { %96 = vmax.xlane.f32.xlu1 %v95_v28 }
  0x2a   :  { %84 = vmax.xlane.f32.xlu0 %v83_v29 }
  0x2d   :  { %99 = vmax.xlane.f32.xlu1 %v98_v30 }
  0x2e   :  { %87 = vmax.xlane.f32.xlu0 %v86_v31 }
  0x9a   :  { %v59_v37 = vpop.xlane.xlu1 %58 }
  0x9b   :  { %v47_v38 = vpop.xlane.xlu0 %46  ;;  %v73_v57 = vmul.f32 0.00390625, %v59_v37 }
  0x9c   :  { %v69_v58 = vmul.f32 0.00390625, %v47_v38  ;;  %v288_v38 = vld [vmem:[%s558_s2] sm:$0xff]  ;;  %s466_s2 = scalar_lea.vmem %s397_s28, 32 }
  0x9d   :  { %v139_v4 = vrot.slane %v73_v57, %v113_v53  ;;  %432 = vmatpush3.xpose.msk.msra.mxu1 %vm292_vm2, %v288_v38  ;;  %p467_p5 = scmp.ne.s32.totalorder %s397_s28, %s466_s2  ;;  %p472_p7 = scmp.lt.s32.totalorder %s466_s2, %s466_s2 }
  0x9e   :  { %v62_v39 = vpop.xlane.xlu1 %61  ;;  %v114_v5 = vrot.slane %v69_v58, %v113_v53 }
  0x9f   :  { %v50_v40 = vpop.xlane.xlu0 %49  ;;  %v74_v55 = vmul.f32 0.00390625, %v62_v39  ;;  %p473_p8 = por %p472_p7, %p471_p6 }
  0xa0   :  { %v70_v59 = vmul.f32 0.00390625, %v50_v40 }
  0xa1   :  { %v143_v3 = vrot.slane %v74_v55, %v118_v54  ;;  %p474_p9 = pnand %p473_p8, %p467_p5 }
  0xa2   :  { %v65_v41 = vpop.xlane.xlu1 %64  ;;  %v119_v6 = vrot.slane %v70_v59, %v118_v54 }
  0xa3   :  { %v53_v43 = vpop.xlane.xlu0 %52  ;;  %v75_v60 = vmul.f32 0.00390625, %v65_v41  ;;  %v144_v18 = vsel %vm120_vm3, %v143_v3, %v139_v4 }
  0xa4   :  { %v71_v62 = vmul.f32 0.00390625, %v53_v43  ;;  %v121_v20 = vsel %vm120_vm3, %v119_v6, %v114_v5 }
  0xa5   :  { %v148_v7 = vrot.slane %v75_v60, %v125_v56 }
  0xa6   :  { %v68_v44 = vpop.xlane.xlu1 %67  ;;  %v126_v9 = vrot.slane %v71_v62, %v125_v56 }
  0xa7   :  { %v56_v46 = vpop.xlane.xlu0 %55  ;;  %v76_v0 = vmul.f32 0.00390625, %v68_v44  ;;  %v149_v21 = vsel %vm127_vm4, %v148_v7, %v144_v18 }
  0xa8   :  { %v72_v2 = vmul.f32 0.00390625, %v56_v46  ;;  %v128_v23 = vsel %vm127_vm4, %v126_v9, %v121_v20 }
  0xa9   :  { %v153_v10 = vrot.slane %v76_v0, %v132_v63 }
  0xaa   :  { %v82_v50 = vpop.xlane.xlu1 %81  ;;  %v133_v14 = vrot.slane %v72_v2, %v132_v63 }
  0xab   :  { %v79_v52 = vpop.xlane.xlu0 %78  ;;  %v173_v15 = vrot.slane %v82_v50, %v118_v54  ;;  %v154_v24 = vsel %vm134_vm5, %v153_v10, %v149_v21 }
  0xac   :  { %v169_v16 = vrot.slane %v79_v52, %v113_v53  ;;  %v135_v28 = vsel %vm134_vm5, %v133_v14, %v128_v23 }
  0xad   :  { %v156_v35 = vsel %vm155_vm6, %v154_v24, %v135_v28 }
  0xae   :  { %v94_v61 = vpop.xlane.xlu1 %93  ;;  %v174_v29 = vsel %vm120_vm3, %v173_v15, %v169_v16 }
  0xaf   :  { %v91_v1 = vpop.xlane.xlu0 %90  ;;  %v192_v11 = vrot.slane %v94_v61, %v118_v54 }
  0xb0   :  { %v188_v12 = vrot.slane %v91_v1, %v113_v53 }
  0xb2   :  { %v97_v8 = vpop.xlane.xlu1 %96  ;;  %v193_v25 = vsel %vm120_vm3, %v192_v11, %v188_v12 }
  0xb3   :  { %v85_v13 = vpop.xlane.xlu0 %84  ;;  %v197_v17 = vrot.slane %v97_v8, %v125_v56 }
  0xb4   :  { %v178_v19 = vrot.slane %v85_v13, %v125_v56 }
  0xb5   :  { %v198_v30 = vsel %vm127_vm4, %v197_v17, %v193_v25 }
  0xb6   :  { %v100_v22 = vpop.xlane.xlu1 %99  ;;  %v179_v32 = vsel %vm127_vm4, %v178_v19, %v174_v29 }
  0xb7   :  { %v202_v26 = vrot.slane %v100_v22, %v132_v63  ;;  %v88_v27 = vpop.xlane.xlu0 %87 }
  0xb8   :  { %v183_v31 = vrot.slane %v88_v27, %v132_v63 }
  0xb9   :  { %v203_v33 = vsel %vm134_vm5, %v202_v26, %v198_v30 }
  0xba   :  { %v184_v34 = vsel %vm134_vm5, %v183_v31, %v179_v32 }
  0xbb   :  { %v205_v36 = vsel %vm204_vm7, %v203_v33, %v184_v34 }
  0xbc   :  { %v208_v37 = vsel %vm207_vm8, %v156_v35, %v205_v36 }
  0xbd   :  { %423 = vmatmul.mubr.msk.f32.vlgmr.msra.gmra.mxu0 %vm210_vm0, %v208_v37 }
 0x17d   :  { %v283_v39 = vpop.f32.mrf.mxu0 }
 0x17e   :  { %v287_v40 = vmax.f32 %v283_v39, 0.0 }
 0x17f   :  { %v424_v41 = vpop.f32.mrf.mxu0 }
 0x180   :  { %434 = vmatmul.mubr.msk.f32.vlgmr.msra.gmra.mxu1 %vm292_vm2, %v287_v40 }
 0x240   :  { %v374_v42 = vpop.f32.mrf.mxu1 }
 0x241   :  { %v379_v43 = vrot.slane %v374_v42, 2 }
 0x242   :  { %v435_v44 = vpop.f32.mrf.mxu1 }
 0x243   :  { %v381_v45 = vadd.f32 %v379_v43, %v374_v42 }
 0x245   :  { %v412_v46 = vmul.f32 -1.442695, %v381_v45 }
 0x247   :  { %442 = vpow2.f32 %v412_v46 }
 0x254   :  { %v443_v47 = vpop.eup %442 }
 0x255   :  { %v385_v48 = vadd.f32 1.0, %v443_v47 }
 0x257   :  { %444 = vrcp.f32 %v385_v48 }
 0x264   :  { %v445_v49 = vpop.eup %444 }
 0x265   :  { %389 = vst.msk [vmem:[#allocation5] sm:$0x3] %vm388_vm9, %v445_v49 }
 0x266   :  { %477 = shalt.err (!%p474_p9)
}
 0x267   :  { %399 = dma.vmem_to_hbm [thread:$0]  %s397_s28, 32, %s559_s3, [#allocation4]  }
 0x268   :  { %488 = dma.done.wait [#allocation4], 32  }
 0x269   :  { %489 = vsyncadd [#allocation4], 4294967264 }
 0x26a   :  { %403 = vsyncpa [#allocation3], 1 }
 0x26b   :  { %404 = vsyncpa [#allocation4], 1 }

</bundles_post_ra>
